<compile_context>
chip_gen: v5e
topology: v5e:2x2
jax: 0.10.0
libtpu: 0.0.40
codegen_flags: <defaults>
</compile_context>

<pallas_src>
import functools
import math

import jax
import jax.numpy as jnp
from jax import lax
from jax.experimental import pallas as pl
from jax.experimental.pallas import tpu as pltpu


def _chip_params():
    """Return (mxu_align, bf16_eup, vmem_capacity_bytes, tq_cap)."""
    kind = ""
    try:
        kind = jax.devices()[0].device_kind.lower()
    except Exception:
        pass

    cap = 0
    try:
        info = pltpu.get_tpu_info()
        cap = int(getattr(info, "vmem_capacity_bytes", 0) or 0)
    except Exception:
        cap = 0

    if "v5" in kind:
        mxu_align, bf16_eup, default_cap, tq_cap = 128, False, 128 << 20, 1024
    elif "v6" in kind:
        mxu_align, bf16_eup, default_cap, tq_cap = 256, True, 128 << 20, 1024
    elif "v7" in kind:
        mxu_align, bf16_eup, default_cap, tq_cap = 256, True, 64 << 20, 512
    else:  # unknown generation: conservative
        mxu_align, bf16_eup, default_cap, tq_cap = 128, False, 64 << 20, 512

    if cap <= 0:
        cap = default_cap
    return mxu_align, bf16_eup, cap, tq_cap


def _step_vmem_bytes(tq, S, D, in_itemsize, w_itemsize, kv_buffers):
    """VMEM needed for one grid step: pipeline blocks + in-kernel temporaries."""
    pipeline = (
        kv_buffers * 2 * S * D * in_itemsize   # k, v resident blocks (x buffers)
        + 2 * 2 * tq * D * in_itemsize         # q, out tiles (double-buffered)
        + 2 * tq * S * w_itemsize              # weights tile (double-buffered)
    )
    # f32 softmax intermediates (scores, exp) + slack for layout/cast copies:
    # with the w_ref store-then-reload structure only ~2x (TQ,S) f32 is live,
    # budget 2.5x for safety.
    intermediates = int(2.5 * tq * S * 4)
    return pipeline + intermediates


def _choose_tq(S, D, in_itemsize, w_itemsize, budget, mxu_align, tq_cap, kv_buffers):
    """Largest MXU-aligned q-tile (<= tq_cap) fitting the VMEM budget."""

    def fits(tq):
        return _step_vmem_bytes(tq, S, D, in_itemsize, w_itemsize, kv_buffers) <= budget

    # Whole-S tile: no padding, block dim equals full array dim (no alignment rule).
    if S <= tq_cap and fits(S):
        return S

    # MXU-aligned candidates, largest first.
    t = (min(tq_cap, S) // mxu_align) * mxu_align
    while t >= mxu_align:
        if fits(t):
            return t
        t -= mxu_align

    # Fallback: sublane-aligned (16 for sub-32-bit packing, 8 for f32).
    sub = 16 if in_itemsize < 4 else 8
    t = max(sub, (min(tq_cap, S) // sub) * sub)
    while t > sub and not fits(t):
        nxt = max(sub, ((t // 2) // sub) * sub)
        if nxt == t:
            break
        t = nxt
    return t


def _attention_kernel(q_ref, k_ref, v_ref, o_ref, w_ref, *,
                      scale, use_bf16_exp, approx_recip):
    # Blocks (batch dim squeezed):
    #   q_ref: (TQ, D)   k_ref/v_ref: (S, D)   o_ref: (TQ, D)   w_ref: (TQ, S)
    # Fold the 1/sqrt(d) scale into q; keep the native dtype so the MXU runs at
    # full rate with f32 accumulation.
    q = q_ref[...] * jnp.asarray(scale, q_ref.dtype)

    # scores = q @ k^T : (TQ, S), contraction over D on the MXU, f32 accum.
    scores = lax.dot_general(
        q, k_ref[...],
        dimension_numbers=(((1,), (1,)), ((), ())),
        preferred_element_type=jnp.float32,
    )

    # Numerically-stable softmax over the last (lane) axis.  NOTE: when
    # S % TQ != 0 the padded rows of the last q-tile operate on garbage but are
    # clipped on store and never mix with valid rows (all reductions are
    # per-row), so no masking is required.
    m = jnp.max(scores, axis=-1, keepdims=True)
    x = scores - m
    if use_bf16_exp:
        # v6e/v7x bf16 EUP path (~2x exp rate); max & denom stay in f32.
        e = jnp.exp(x.astype(jnp.bfloat16))
        denom = jnp.sum(e, axis=-1, keepdims=True, dtype=jnp.float32)
    else:
        e = jnp.exp(x)
        denom = jnp.sum(e, axis=-1, keepdims=True)

    recip = pl.reciprocal(denom, approx=approx_recip)

    # Store the narrowed weights first, then feed the PV matmul from w_ref so
    # only one (TQ,S) f32 temporary is live through the second dot.
    w_ref[...] = (e * recip.astype(e.dtype)).astype(w_ref.dtype)

    # output = weights @ v : (TQ, D) on the MXU with f32 accumulation.
    out = jnp.dot(w_ref[...].astype(v_ref.dtype), v_ref[...],
                  preferred_element_type=jnp.float32)
    o_ref[...] = out.astype(o_ref.dtype)


def attention(q, k, v):
    """Pallas version of Attention.forward. Returns (output, attention_weights)."""
    B, S, D = q.shape
    assert k.shape == (B, S, D) and v.shape == (B, S, D)
    assert k.dtype == q.dtype and v.dtype == q.dtype

    # PyTorch module: d = q.shape[1] (sequence length); scores /= sqrt(d).
    scale = 1.0 / math.sqrt(float(S))

    in_itemsize = jnp.dtype(q.dtype).itemsize
    w_dtype = q.dtype  # matches torch softmax dtype behaviour for bf16/f32
    w_itemsize = jnp.dtype(w_dtype).itemsize

    mxu_align, bf16_eup, cap, tq_cap = _chip_params()

    # VMEM budget: 3/4 of capacity (minus a reserve) on 128-MiB parts, half of
    # capacity on 64-MiB v7x.
    reserve = 8 << 20  # Mosaic internal scratch + misc headroom
    if cap >= (96 << 20):
        budget = (cap * 3) // 4 - reserve
    else:
        budget = cap // 2

    # Long-S fallback (mainly v7x): resident K/V only change at batch
    # boundaries, so if double-buffering them eats too much of the budget,
    # drop to single-buffering (one exposed DMA per batch element).
    kv_buffers = 2
    if 2 * (2 * S * D * in_itemsize) > budget // 2:
        kv_buffers = 1
    # TODO(synk): if even single-buffered resident K/V exceeds the budget
    # (extremely long S on v7x), switch to KV-axis tiling with online softmax
    # plus a normalization pass over the stored weights.

    TQ = _choose_tq(S, D, in_itemsize, w_itemsize, budget,
                    mxu_align, tq_cap, kv_buffers)
    nq = pl.cdiv(S, TQ)

    step_bytes = _step_vmem_bytes(TQ, S, D, in_itemsize, w_itemsize, kv_buffers)
    vmem_limit = int(min(cap - (4 << 20),
                         max(32 << 20, step_bytes + reserve)))

    use_bf16_exp = bool(bf16_eup and q.dtype == jnp.bfloat16)
    approx_recip = bool(w_dtype == jnp.bfloat16)

    kernel = functools.partial(
        _attention_kernel,
        scale=scale,
        use_bf16_exp=use_bf16_exp,
        approx_recip=approx_recip,
    )

    # K/V specs: resident per batch element; optionally single-buffered.
    def _kv_spec():
        if kv_buffers == 1:
            try:
                return pl.BlockSpec((None, S, D), lambda b, i: (b, 0, 0),
                                    pipeline_mode=pl.Buffered(1))
            except TypeError:
                pass
        return pl.BlockSpec((None, S, D), lambda b, i: (b, 0, 0))

    k_spec = _kv_spec()
    v_spec = _kv_spec()

    # Megacore: split on the batch axis when B >= 2 so each TensorCore keeps
    # its own batch's K/V resident; for B == 1 let both axes be parallel so
    # the q axis can be split instead.
    if B >= 2:
        dims = ("parallel", "arbitrary")
    else:
        dims = ("parallel", "parallel")

    # Advisory cost estimate: two S^2*D matmuls, S^2 exps, HBM traffic
    # dominated by the B*S^2 weights write.
    cost = pl.CostEstimate(
        flops=4 * B * S * S * D,
        transcendentals=B * S * S,
        bytes_accessed=(4 * B * S * D * in_itemsize + B * S * S * w_itemsize),
    )

    out_shapes = (
        jax.ShapeDtypeStruct((B, S, D), q.dtype),   # output
        jax.ShapeDtypeStruct((B, S, S), w_dtype),   # attention weights
    )

    return pl.pallas_call(
        kernel,
        out_shape=out_shapes,
        grid_spec=pltpu.PrefetchScalarGridSpec(
            num_scalar_prefetch=0,
            grid=(B, nq),  # q-tile axis innermost: K/V stay resident per batch
            in_specs=[
                pl.BlockSpec((None, TQ, D), lambda b, i: (b, i, 0)),  # q tile
                k_spec,                                               # k (resident)
                v_spec,                                               # v (resident)
            ],
            out_specs=[
                pl.BlockSpec((None, TQ, D), lambda b, i: (b, i, 0)),  # output tile
                pl.BlockSpec((None, TQ, S), lambda b, i: (b, i, 0)),  # weights tile
            ],
        ),
        compiler_params=pltpu.CompilerParams(
            dimension_semantics=dims,
            vmem_limit_bytes=vmem_limit,
        ),
        cost_estimate=cost,
    )(q, k, v)


def _attention_ref(q, k, v):
    """Plain-JAX reference mirroring the PyTorch forward."""
    d = jnp.float32(q.shape[1])
    scores = jnp.einsum("bqd,bkd->bqk", q, k) / jnp.sqrt(d)
    w = jax.nn.softmax(scores, axis=-1)
    out = jnp.einsum("bqk,bkd->bqd", w, v)
    return out, w


if __name__ == "__main__":
    key = jax.random.PRNGKey(0)
    kq, kk, kv = jax.random.split(key, 3)

    B, S, D = 2, 8, 32
    q = jax.random.normal(kq, (B, S, D), dtype=jnp.float32)
    k = jax.random.normal(kk, (B, S, D), dtype=jnp.float32)
    v = jax.random.normal(kv, (B, S, D), dtype=jnp.float32)

    out, weights = attention(q, k, v)
    jax.block_until_ready((out, weights))

    out_ref, w_ref = _attention_ref(q, k, v)
    assert jnp.allclose(out, out_ref, atol=1e-5, rtol=1e-5), "output mismatch"
    assert jnp.allclose(weights, w_ref, atol=1e-5, rtol=1e-5), "weights mismatch"

    print("KERNEL_OK")
</pallas_src>

<mosaic_0001>
module attributes {stable_mosaic.version = 11 : i64} {
  func.func @_attention_kernel(%arg0: i32, %arg1: i32, %arg2: memref<1x8x32xf32, #tpu.memory_space<vmem>>, %arg3: memref<1x8x32xf32, #tpu.memory_space<vmem>>, %arg4: memref<1x8x32xf32, #tpu.memory_space<vmem>>, %arg5: memref<1x8x32xf32, #tpu.memory_space<vmem>>, %arg6: memref<1x8x8xf32, #tpu.memory_space<vmem>>) attributes {dimension_semantics = [#tpu.dimension_semantics<parallel>, #tpu.dimension_semantics<arbitrary>], iteration_bounds = array<i64: 2, 1>, scalar_prefetch = 0 : i64, scratch_operands = 0 : i64, tpu.core_type = #tpu.core_type<tc>, window_params = [{transform_indices = @transform_0, window_bounds = array<i64: 1, 8, 32>}, {transform_indices = @transform_1, window_bounds = array<i64: 1, 8, 32>}, {transform_indices = @transform_2, window_bounds = array<i64: 1, 8, 32>}, {transform_indices = @transform_3, window_bounds = array<i64: 1, 8, 32>}, {transform_indices = @transform_4, window_bounds = array<i64: 1, 8, 8>}]} {
    %c0 = arith.constant 0 : index
    %c0_0 = arith.constant 0 : index
    %c0_1 = arith.constant 0 : index
    %0 = vector.load %arg2[%c0, %c0_0, %c0_1] : memref<1x8x32xf32, #tpu.memory_space<vmem>>, vector<1x8x32xf32>
    %1 = vector.shape_cast %0 : vector<1x8x32xf32> to vector<8x32xf32>
    %cst = arith.constant 0.353553385 : f32
    %2 = vector.broadcast %cst : f32 to vector<8x32xf32>
    %3 = arith.mulf %1, %2 : vector<8x32xf32>
    %c0_2 = arith.constant 0 : index
    %c0_3 = arith.constant 0 : index
    %c0_4 = arith.constant 0 : index
    %4 = vector.load %arg3[%c0_2, %c0_3, %c0_4] : memref<1x8x32xf32, #tpu.memory_space<vmem>>, vector<1x8x32xf32>
    %5 = vector.shape_cast %4 : vector<1x8x32xf32> to vector<8x32xf32>
    %cst_5 = arith.constant dense<0.000000e+00> : vector<8x8xf32>
    %6 = tpu.matmul %3, %5, %cst_5 {dimension_numbers = #tpu.dot_dimension_numbers<[1], [1], [0], [0], [0, 0, 1, 0], [], []>} : vector<8x32xf32>, vector<8x32xf32>, vector<8x8xf32> -> vector<8x8xf32>
    %cst_6 = arith.constant dense<0xFF800000> : vector<8xf32>
    %7 = vector.multi_reduction <maximumf>, %6, %cst_6 [1] : vector<8x8xf32> to vector<8xf32>
    %8 = vector.shape_cast %7 : vector<8xf32> to vector<8x1xf32>
    %9 = vector.broadcast %8 : vector<8x1xf32> to vector<8x8xf32>
    %10 = arith.subf %6, %9 : vector<8x8xf32>
    %11 = math.exp %10 : vector<8x8xf32>
    %cst_7 = arith.constant dense<0.000000e+00> : vector<8xf32>
    %12 = vector.multi_reduction <add>, %11, %cst_7 [1] : vector<8x8xf32> to vector<8xf32>
    %13 = vector.shape_cast %12 : vector<8xf32> to vector<8x1xf32>
    %14 = tpu.reciprocal %13 : vector<8x1xf32> -> vector<8x1xf32>
    %15 = vector.broadcast %14 : vector<8x1xf32> to vector<8x8xf32>
    %16 = arith.mulf %11, %15 : vector<8x8xf32>
    %c0_8 = arith.constant 0 : index
    %c0_9 = arith.constant 0 : index
    %c0_10 = arith.constant 0 : index
    %17 = vector.load %arg6[%c0_8, %c0_9, %c0_10] : memref<1x8x8xf32, #tpu.memory_space<vmem>>, vector<1x8x8xf32>
    %18 = vector.shape_cast %17 : vector<1x8x8xf32> to vector<8x8xf32>
    %19 = vector.shape_cast %16 : vector<8x8xf32> to vector<1x8x8xf32>
    tpu.vector_store %arg6[%c0_8, %c0_9, %c0_10], %19 {strides = array<i32>} : memref<1x8x8xf32, #tpu.memory_space<vmem>>, vector<1x8x8xf32>,
    %c0_11 = arith.constant 0 : index
    %c0_12 = arith.constant 0 : index
    %c0_13 = arith.constant 0 : index
    %20 = vector.load %arg6[%c0_11, %c0_12, %c0_13] : memref<1x8x8xf32, #tpu.memory_space<vmem>>, vector<1x8x8xf32>
    %21 = vector.shape_cast %20 : vector<1x8x8xf32> to vector<8x8xf32>
    %c0_14 = arith.constant 0 : index
    %c0_15 = arith.constant 0 : index
    %c0_16 = arith.constant 0 : index
    %22 = vector.load %arg4[%c0_14, %c0_15, %c0_16] : memref<1x8x32xf32, #tpu.memory_space<vmem>>, vector<1x8x32xf32>
    %23 = vector.shape_cast %22 : vector<1x8x32xf32> to vector<8x32xf32>
    %cst_17 = arith.constant dense<0.000000e+00> : vector<8x32xf32>
    %24 = tpu.matmul %21, %23, %cst_17 {dimension_numbers = #tpu.dot_dimension_numbers<[1], [0], [0], [1], [0, 0, 1, 1], [], []>} : vector<8x8xf32>, vector<8x32xf32>, vector<8x32xf32> -> vector<8x32xf32>
    %c0_18 = arith.constant 0 : index
    %c0_19 = arith.constant 0 : index
    %c0_20 = arith.constant 0 : index
    %25 = vector.load %arg5[%c0_18, %c0_19, %c0_20] : memref<1x8x32xf32, #tpu.memory_space<vmem>>, vector<1x8x32xf32>
    %26 = vector.shape_cast %25 : vector<1x8x32xf32> to vector<8x32xf32>
    %27 = vector.shape_cast %24 : vector<8x32xf32> to vector<1x8x32xf32>
    tpu.vector_store %arg5[%c0_18, %c0_19, %c0_20], %27 {strides = array<i32>} : memref<1x8x32xf32, #tpu.memory_space<vmem>>, vector<1x8x32xf32>,
    return
  }
  func.func @transform_0(%arg0: i32, %arg1: i32) -> (i32, i32, i32) {
    %c0_i32 = arith.constant 0 : i32
    %c0_i32_0 = arith.constant 0 : i32
    return %arg0, %arg1, %c0_i32 : i32, i32, i32
  }
  func.func @transform_1(%arg0: i32, %arg1: i32) -> (i32, i32, i32) {
    %c0_i32 = arith.constant 0 : i32
    %c0_i32_0 = arith.constant 0 : i32
    %c0_i32_1 = arith.constant 0 : i32
    return %arg0, %c0_i32, %c0_i32_0 : i32, i32, i32
  }
  func.func @transform_2(%arg0: i32, %arg1: i32) -> (i32, i32, i32) {
    %c0_i32 = arith.constant 0 : i32
    %c0_i32_0 = arith.constant 0 : i32
    %c0_i32_1 = arith.constant 0 : i32
    return %arg0, %c0_i32, %c0_i32_0 : i32, i32, i32
  }
  func.func @transform_3(%arg0: i32, %arg1: i32) -> (i32, i32, i32) {
    %c0_i32 = arith.constant 0 : i32
    %c0_i32_0 = arith.constant 0 : i32
    return %arg0, %arg1, %c0_i32 : i32, i32, i32
  }
  func.func @transform_4(%arg0: i32, %arg1: i32) -> (i32, i32, i32) {
    %c0_i32 = arith.constant 0 : i32
    %c0_i32_0 = arith.constant 0 : i32
    return %arg0, %arg1, %c0_i32 : i32, i32, i32
  }
}

</mosaic_0001>

<bundles_post_ra>
// kernel: tpu_custom_call.1
= control target key start
LH: loop header
LB: loop body
LE: loop exit
PB: predicated region body
PF: predicated region fallthrough
CT: control target
= control target key end

     0   :  { %s1117_s0 = inlined_call_operand.hbm [shape: f32[2,8,32], index: 0, kind: input, shape index: {}]   ;;  %s1118_s1 = inlined_call_operand.hbm [shape: f32[2,8,32], index: 1, kind: input, shape index: {}]   ;;  %s1119_s2 = inlined_call_operand.hbm [shape: f32[2,8,32], index: 2, kind: input, shape index: {}]   ;;  %s1120_s3 = inlined_call_operand.hbm [shape: f32[2,8,32], index: 3, kind: output, shape index: {0}]   ;;  %s1121_s4 = inlined_call_operand.hbm [shape: f32[2,8,8], index: 4, kind: output, shape index: {1}]  }
   0x1   :  { %1125 = sst [smem:[#allocation19_spill]] %s1118_s1 }
   0x2   :  { %10 = vsyncpa [#allocation3], 0 }
   0x3   :  { %12 = vsyncpa [#allocation3 + $0x1], 0 }
   0x4   :  { %13 = vsyncpa [#allocation6], 0 }
   0x5   :  { %15 = vsyncpa [#allocation6 + $0x1], 0 }
   0x6   :  { %16 = vsyncpa [#allocation4], 0 }
   0x7   :  { %18 = vsyncpa [#allocation4 + $0x1], 0 }
   0x8   :  { %19 = vsyncpa [#allocation10], 0 }
   0x9   :  { %21 = vsyncpa [#allocation10 + $0x1], 0  ;;  %s937_s15 = smov 0   ;;  %s939_s16 = smov 0  }
   0xa   :  { %s941_s17 = smov 0   ;;  %s943_s18 = smov 0  }
   0xb   :  { %s945_s19 = smov 0   ;;  %s947_s20 = smov 0  }
   0xc LB: > { %1126 = sst [smem:[#allocation15_spill]] %s898_s17  ;;  %s968_s21 = sadd.s32 4294967295, %s910_s20   ;;  %s910_s20 = sphi %s947_s20, %s27_s20   ;;  %s906_s19 = sphi %s945_s19, %s1140_s19   ;;  %s902_s18 = sphi %s943_s18, %s1139_s18   ;;  %s898_s17 = sphi %s941_s17, %s1138_s17   ;;  %s894_s16 = sphi %s939_s16, %s1142_s16   ;;  %s890_s15 = sphi %s937_s15, %s1141_s15  }
   0xd   : > { %1127 = sst [smem:[#allocation16_spill]] %s906_s19  ;;  %s597_s22 = sadd.s32 4294967294, %s910_s20  }
   0xe   : > { %s39_s23 = sadd.s32 1, %s906_s19  ;;  %s48_s24 = sadd.s32 1, %s898_s17 }
   0xf   : > { %p41_p0 = scmp.ge.s32.totalorder %s39_s23, 2  ;;  %p55_p1 = scmp.ne.s32.totalorder %s898_s17, %s894_s16 }
  0x10   : > { %p56_p2 = scmp.eq.s32.totalorder %s910_s20, 0  ;;  %p61_p3 = scmp.ne.s32.totalorder %s894_s16, %s890_s15 }
  0x11   : > { %s1144_s23 = smov (%p41_p0, %s39_s23), 0  ;;  %p62_p5 = scmp.eq.s32.totalorder %s968_s21, 0 }
  0x12   : > { %1128 = sst [smem:[#allocation17_spill]] %s1144_s23  ;;  %p980_p4 = por %p56_p2, %p55_p1 }
  0x13   : > { %s43_s26 = ssub.s32 %s906_s19, %s1144_s23  ;;  %p139_p6 = scmp.eq.s32.totalorder %s968_s21, 1 }
  0x14   : > { %p46_p7 = scmp.eq.s32.totalorder %s43_s26, 0  ;;  %p988_p8 = por %p62_p5, %p61_p3 }
  0x15   : > { %p992_p9 = por %p139_p6, %p55_p1  ;;  %p145_p10 = scmp.eq.s32.totalorder %s597_s22, 1 }
  0x16   : > { %s997_s29 = scalar_select %p46_p7, %s898_s17, %s48_s24  }
  0x17   : > { %p999_p11 = por %p145_p10, %p61_p3  ;;  %p599_p12 = scmp.ge.s32.totalorder %s910_s20, 2 }
  0x18   : > { %1132 = sst [smem:[#allocation18_spill]] %s997_s29  ;;  %p648_p13 = scmp.lt.s32.totalorder %s910_s20, 2 }
  0x19   : > { %s193_s5 = sand.u32 1, %s898_s17   ;;  %s601_s7 = sshll.u32 %s906_s19, 3 }
  0x1a   : > { %s600_s6 = sshll.u32 %s193_s5, 3  ;;  %p1009_p0 = pnand %p648_p13, %p980_p4 }
  0x1b   : > { %s213_s9 = sand.u32 1, %s910_s20   ;;  %s1135_s1 = sld [smem:[#allocation19_spill]] }
  0x1c   : > { %s217_s14 = scalar_lea.vmem [#allocation5], %s600_s6  ;;  %s214_s24 = scalar_lea.sflag [#allocation6], %s213_s9 }
  0x1d   : > { %s225_s22 = sshll.u32 %s217_s14, 4  ;;  %p606_p1 = scmp.ge.s32.totalorder %s910_s20, 1  ;;  %s226_s22 = int_to_ptr.vmem [resolvable:$true] %s225_s22 }
  0x1e   : > { %p249_p2 = scmp.lt.s32.totalorder %s910_s20, 3  ;;  %s202_s10 = scalar_lea.hbm %s1117_s0, %s601_s7 }
  0x1f   : > { %s204_s11 = sshll.u32 %s202_s10, 4  ;;  %s194_s14 = scalar_lea.sflag [#allocation3], %s193_s5  ;;  %s205_s11 = int_to_ptr.hbm [resolvable:$true] %s204_s11 }
  0x20   : > { %p1021_p3 = pnand %p606_p1, %p249_p2  ;;  %s236_s29 = scalar_lea.vmem [#allocation7], %s600_s6 }
  0x21   : > { %s221_s12 = scalar_lea.hbm %s1135_s1, %s601_s7  ;;  %s244_s17 = sshll.u32 %s236_s29, 4  ;;  %s245_s17 = int_to_ptr.vmem [resolvable:$true] %s244_s17 }
  0x22   : > { %s223_s13 = sshll.u32 %s221_s12, 4  ;;  %s197_s12 = scalar_lea.vmem [#allocation2], %s600_s6  ;;  %s224_s13 = int_to_ptr.hbm [resolvable:$true] %s223_s13 }
  0x23   : > { %637 = dma.hbm_to_vmem [thread:$0]  (!%p1009_p0), %s224_s13, 128, %s226_s22, %s214_s24  }
  0x24   : > { %s206_s1 = sshll.u32 %s197_s12, 4  ;;  %s240_s22 = scalar_lea.hbm %s1119_s2, %s601_s7  ;;  %s207_s1 = int_to_ptr.vmem [resolvable:$true] %s206_s1 }
  0x25   : > { %634 = dma.hbm_to_vmem [thread:$0]  (!%p1009_p0), %s205_s11, 128, %s207_s1, %s194_s14  }
  0x26   : > { %s242_s19 = sshll.u32 %s240_s22, 4  ;;  %253 = sbr.rel (%p1021_p3) target bundleno = 578 (0x242), region = 32  ;;  %s243_s19 = int_to_ptr.hbm [resolvable:$true] %s242_s19 }
  0x27   : > { %640 = dma.hbm_to_vmem [thread:$0]  (!%p1009_p0), %s243_s19, 128, %s245_s17, %s214_s24  }
  0x28   : > { %s1038_s23 = sand.u32 (!%p1021_p3), 1, %s894_s16  }
  0x29   : > { %s1041_s1 = sshll.u32 (!%p1021_p3), %s1038_s23, 3  ;;  %s256_s5 = scalar_lea.sflag (!%p1021_p3), [#allocation3], %s1038_s23 }
  0x2a   : > { %s259_s7 = scalar_lea.vmem (!%p1021_p3), [#allocation2], %s1041_s1 }
  0x2b   : > { %873 = dma.done.wait (%p988_p8), %s256_s5, 128  }
  0x2c   : > { %875 = vsyncadd (%p988_p8), %s256_s5, 4294967168  ;;  %s265_s17 = sand.u32 1, %s968_s21   ;;  %s269_s29 = scalar_lea.vmem [#allocation5], %s1041_s1 }
  0x2d   : > { %s266_s19 = scalar_lea.sflag [#allocation6], %s265_s17 }
  0x2e   : > { %877 = dma.done.wait (%p988_p8), %s266_s19, 256  }
  0x2f   : > { %879 = vsyncadd (%p988_p8), %s266_s19, 4294967040  ;;  %vm323_vm0 = vcmask 261120   ;;  %v322_v0 = vld [vmem:[%s269_s29] sm:$0xff]  ;;  %v320_v1 = vld [vmem:[%s259_s7] sm:$0xff]  ;;  %vm350_vm1 = vcmask 64512   ;;  %s279_s21 = scalar_lea.vmem [#allocation7], %s1041_s1 }
  0x30   : > { %612 = vmatpush.xpose.msk.msra.mxu0 %vm323_vm0, %v322_v0  ;;  %v321_v2 = vmul.f32 0.35355338, %v320_v1  ;;  %v377_v10 = vld [vmem:[%s279_s21] sm:$0xff]  ;;  %s319_s27 = scalar_lea.vmem [#allocation9], %s1041_s1  ;;  %s617_s6 = sshll.u32 %s902_s18, 3 }
  0x31   : > { %396 = vmatpush.msra.mxu1 %v377_v10  ;;  %s434_s25 = scalar_lea.hbm %s1121_s4, %s617_s6  ;;  %s436_s26 = sshll.u32 %s319_s27, 4  ;;  %s437_s26 = int_to_ptr.vmem [resolvable:$true] %s436_s26 }
  0x32   : > { %s438_s10 = sshll.u32 %s434_s25, 4  ;;  %s408_s11 = scalar_lea.sflag [#allocation10], %s1038_s23  ;;  %s439_s10 = int_to_ptr.hbm [resolvable:$true] %s438_s10 }
  0x33   : > { %613 = vmatmul.msk.f32.vlgmr.msra.gmra.mxu0 %vm323_vm0, %v321_v2  ;;  %s806_s12 = sshra.s32 %s439_s10, 4  ;;  %s812_s13 = scalar_lea.hbm %s1121_s4, 16  ;;  %s807_s12 = int_to_ptr.hbm [resolvable:$true] %s806_s12 }
  0x34   : > { %s808_s14 = scalar_lea.hbm %s807_s12, 8  ;;  %p813_p7 = scmp.lt.s32.totalorder %s807_s12, %s1121_s4 }
  0x35   : > { %p809_p4 = scmp.ne.s32.totalorder %s807_s12, %s808_s14  ;;  %p814_p8 = scmp.lt.s32.totalorder %s812_s13, %s808_s14 }
  0x37   : > { %p810_p5 = pnand %p809_p4, %p992_p9  ;;  %p815_p10 = por %p814_p8, %p813_p7 }
  0x39   : > { %p811_p6 = pneg %p810_p5 }
  0x3b   : > { %p816_p13 = pnand %p815_p10, %p811_p6 }
  0xb0   : > { %v347_v3 = vpop.f32.mrf.mxu0 }
  0xb1   : > { %v351_v4 = vsel %vm350_vm1, %v347_v3, -inf }
  0xb2   : > { %352 = vmax.xlane.f32.xlu0 %v351_v4 }
 0x125   : > { %v353_v5 = vpop.xlane.xlu0 %352 }
 0x126   : > { %v354_v6 = vsub.f32 %v347_v3, %v353_v5 }
 0x128   : > { %v355_v7 = vmul.f32 1.442695, %v354_v6 }
 0x12a   : > { %698 = vpow2.f32 %v355_v7 }
 0x130   : > { %v699_v8 = vpop.eup %698 }
 0x131   : > { %v357_v9 = vsel %vm350_vm1, %v699_v8, 0.0 }
 0x132   : > { %358 = vadd.xlane.f32.xlu0 %v357_v9 }
 0x1a5   : > { %v359_v11 = vpop.xlane.xlu0 %358 }
 0x1a6   : > { %700 = vrcp.f32 %v359_v11  ;;  %v371_v15 = vand.u32 2147483648, %v359_v11  ;;  %v369_v17 = vand.u32 2147483647, %v359_v11  ;;  %vm365_vm3 = vweird.f32 %v359_v11 }
 0x1a8   : > { %v372_v19 = vor.u32 1.1754944e-38, %v371_v15  ;;  %vm370_vm5 = vcmp.eq.f32.partialorder %v369_v17, 8.507059e+37 }
 0x1ac   : > { %v701_v12 = vpop.eup %700 }
 0x1ad   : > { %v361_v13 = vmul.f32 %v701_v12, %v359_v11  ;;  %vm366_vm2 = vweird.f32 %v701_v12 }
 0x1ae   : > { %vm367_vm4 = vmor %vm365_vm3, %vm366_vm2 }
 0x1af   : > { %v362_v14 = vsub.f32 1.0, %v361_v13 }
 0x1b1   : > { %v363_v16 = vmul.f32 %v701_v12, %v362_v14 }
 0x1b3   : > { %v364_v18 = vadd.f32 %v701_v12, %v363_v16 }
 0x1b5   : > { %v368_v20 = vsel %vm367_vm4, %v701_v12, %v364_v18 }
 0x1b6   : > { %v373_v21 = vsel %vm370_vm5, %v372_v19, %v368_v20 }
 0x1b7   : > { %v374_v22 = vmul.f32 %v699_v8, %v373_v21 }
 0x1b9   : > { %375 = vst.msk [vmem:[%s319_s27] sm:$0xff] %vm350_vm1, %v374_v22 }
 0x1c0   : > { %v376_v23 = vld [vmem:[%s319_s27] sm:$0xff] }
 0x1c1   : > { %614 = vmatmul.msk.f32.vlgmr.msra.gmra.mxu1 %vm350_vm1, %v376_v23 }
 0x1c2   : > { %819 = shalt.err (!%p816_p13)
}
 0x1c3   : > { %628 = dma.vmem_to_hbm [thread:$0]  (%p992_p9), %s437_s26, 128, %s439_s10, %s408_s11  }
 0x1c4   : > { %s419_s19 = scalar_lea.hbm %s1120_s3, %s617_s6  ;;  %s312_s29 = scalar_lea.vmem [#allocation8], %s1041_s1 }
 0x1c5   : > { %s421_s21 = sshll.u32 %s312_s29, 4  ;;  %s423_s27 = sshll.u32 %s419_s19, 4  ;;  %s422_s21 = int_to_ptr.vmem [resolvable:$true] %s421_s21  ;;  %s424_s27 = int_to_ptr.hbm [resolvable:$true] %s423_s27 }
 0x1c6   : > { %s403_s8 = scalar_lea.sflag [#allocation4], %s1038_s23  ;;  %s834_s24 = sshra.s32 %s424_s27, 4  ;;  %s835_s24 = int_to_ptr.hbm [resolvable:$true] %s834_s24 }
 0x1c7   : > { %s836_s25 = scalar_lea.hbm %s835_s24, 8  ;;  %s840_s6 = scalar_lea.hbm %s1120_s3, 16 }
 0x1c8   : > { %p837_p0 = scmp.ne.s32.totalorder %s835_s24, %s836_s25  ;;  %p841_p3 = scmp.lt.s32.totalorder %s835_s24, %s1120_s3 }
 0x1c9   : > { %p842_p4 = scmp.lt.s32.totalorder %s840_s6, %s836_s25 }
 0x1ca   : > { %p838_p1 = pnand %p837_p0, %p992_p9 }
 0x1cb   : > { %p843_p5 = por %p842_p4, %p841_p3 }
 0x1cc   : > { %p839_p2 = pneg %p838_p1 }
 0x1ce   : > { %p844_p6 = pnand %p843_p5, %p839_p2 }
 0x23e   : > { %v398_v24 = vpop.f32.mrf.mxu1 }
 0x23f   : > { %401 = vst.msk [vmem:[%s312_s29] sm:$0xff] %vm323_vm0, %v398_v24 }
 0x240   : > { %847 = shalt.err (!%p844_p6)
}
 0x241   : > { %627 = dma.vmem_to_hbm [thread:$0]  (%p992_p9), %s422_s21, 128, %s424_s27, %s403_s8  }
 0x242 PF: > { %s450_s23 = sand.u32 1, %s890_s15   ;;  %p642_p7 = pnand %p599_p12, %p999_p11 }
 0x243   : > { %s451_s12 = scalar_lea.sflag [#allocation4], %s450_s23 }
 0x244   : > { %p643_p8 = pneg %p642_p7 }
 0x246   : > { %881 = dma.done.wait (%p643_p8), %s451_s12, 128  }
 0x247   : > { %883 = vsyncadd (%p643_p8), %s451_s12, 4294967168  ;;  %s461_s14 = scalar_lea.sflag [#allocation10], %s450_s23 }
 0x248   : > { %885 = dma.done.wait (%p643_p8), %s461_s14, 128  }
 0x249   : > { %887 = vsyncadd (%p643_p8), %s461_s14, 4294967168  ;;  %s27_s20 = sadd.s32 1, %s910_s20   ;;  %s1137_s28 = sld [smem:[#allocation15_spill]] }
 0x24a   : > { %p24_p10 = scmp.ge.s32.totalorder %s27_s20, 4   ;;  %s1138_s17 = sld [smem:[#allocation18_spill]] }
 0x24b   : > { %s1139_s18 = sld [smem:[#allocation16_spill]]  ;;  %s1141_s15 = smov %s894_s16 }
 0x24c   : > { %s1140_s19 = sld [smem:[#allocation17_spill]]  ;;  %26 = sbr.rel (!%p24_p10) target bundleno = 12 (0xc), region = 118 }
 0x24f   : > { %s1142_s16 = smov %s1137_s28 }
 0x251   :  { %467 = vsyncpa [#allocation3], 1 }
 0x252   :  { %469 = vsyncpa [#allocation3 + $0x1], 1 }
 0x253   :  { %470 = vsyncpa [#allocation6], 1 }
 0x254   :  { %472 = vsyncpa [#allocation6 + $0x1], 1 }
 0x255   :  { %473 = vsyncpa [#allocation4], 1 }
 0x256   :  { %475 = vsyncpa [#allocation4 + $0x1], 1 }
 0x257   :  { %476 = vsyncpa [#allocation10], 1 }
 0x258   :  { %478 = vsyncpa [#allocation10 + $0x1], 1 }

</bundles_post_ra>
